<compile_context>
chip_gen: v7x
topology: tpu7x:2x2x1
jax: 0.10.0
libtpu: 0.0.40
codegen_flags: <defaults>
</compile_context>

<pallas_src>
import jax
import jax.numpy as jnp
from jax.experimental import pallas as pl
from jax.experimental.pallas import tpu as pltpu

HIDDEN = 128


def _mlp_policy_kernel(x_ref, w1_ref, b1_ref, w2_ref, b2_ref, w3_ref, b3_ref, o_ref):
    # fc1: bf16 MXU matmul, f32 accumulation; bias + ReLU in f32.
    h1 = jnp.dot(x_ref[...], w1_ref[...], preferred_element_type=jnp.float32)
    h1 = jnp.maximum(h1 + b1_ref[...], 0.0)

    # fc2
    h2 = jnp.dot(h1.astype(jnp.bfloat16), w2_ref[...],
                 preferred_element_type=jnp.float32)
    h2 = jnp.maximum(h2 + b2_ref[...], 0.0)

    # fc3 -> logits (TB, A)
    logits = jnp.dot(h2.astype(jnp.bfloat16), w3_ref[...],
                     preferred_element_type=jnp.float32) + b3_ref[...]

    # Fused, numerically stable softmax over the last (action) axis.
    logits = logits - jnp.max(logits, axis=-1, keepdims=True)
    e = jnp.exp(logits)
    probs = e / jnp.sum(e, axis=-1, keepdims=True)

    o_ref[...] = probs.astype(o_ref.dtype)


def ppo_policy_forward(x, params, *, tb=256):
    """x: (B, input_dim) float32. Returns softmax probabilities (B, output_dim) f32."""
    w1, b1, w2, b2, w3, b3 = params
    B, D = x.shape
    A = w3.shape[1]

    # bf16 matmul operands (halves weight/input DMA bytes, native MXU path);
    # biases stay f32 for the f32 epilogue.
    xb = x.astype(jnp.bfloat16)
    w1b = w1.astype(jnp.bfloat16)
    w2b = w2.astype(jnp.bfloat16)
    w3b = w3.astype(jnp.bfloat16)

    # Batch tile: multiple of 8 sublanes, capped at `tb`; pad batch to a multiple.
    TB = min(tb, max(8, ((B + 7) // 8) * 8))
    B_pad = ((B + TB - 1) // TB) * TB
    if B_pad != B:
        xb = jnp.pad(xb, ((0, B_pad - B), (0, 0)))
    n_tiles = B_pad // TB

    resident = lambda shape: pl.BlockSpec(shape, lambda i: (0, 0))

    out = pl.pallas_call(
        _mlp_policy_kernel,
        out_shape=jax.ShapeDtypeStruct((B_pad, A), jnp.float32),
        grid_spec=pltpu.PrefetchScalarGridSpec(
            num_scalar_prefetch=0,
            grid=(n_tiles,),
            in_specs=[
                pl.BlockSpec((TB, D), lambda i: (i, 0)),   # x: tiled over batch
                resident((D, HIDDEN)),                     # w1 (VMEM-resident)
                resident((1, HIDDEN)),                     # b1
                resident((HIDDEN, HIDDEN)),                # w2
                resident((1, HIDDEN)),                     # b2
                resident((HIDDEN, A)),                     # w3
                resident((1, A)),                          # b3
            ],
            out_specs=pl.BlockSpec((TB, A), lambda i: (i, 0)),
        ),
        compiler_params=pltpu.CompilerParams(
            dimension_semantics=("parallel",),             # shards across v7x's 2 TCs
        ),
    )(xb, w1b, b1, w2b, b2, w3b, b3)

    return out[:B]


def init_params(key, input_dim, output_dim):
    """Deterministic synthetic init (uniform, roughly like PyTorch's default)."""
    ks = jax.random.split(key, 6)

    def lin(kw, kb, fan_in, fan_out):
        bound = 1.0 / jnp.sqrt(fan_in)
        w = jax.random.uniform(kw, (fan_in, fan_out), jnp.float32, -bound, bound)
        b = jax.random.uniform(kb, (1, fan_out), jnp.float32, -bound, bound)
        return w, b

    w1, b1 = lin(ks[0], ks[1], input_dim, HIDDEN)
    w2, b2 = lin(ks[2], ks[3], HIDDEN, HIDDEN)
    w3, b3 = lin(ks[4], ks[5], HIDDEN, output_dim)
    return (w1, b1, w2, b2, w3, b3)


def reference_forward(x, params):
    """Pure-JAX reference with the same bf16-operand / f32-accumulate recipe."""
    w1, b1, w2, b2, w3, b3 = params
    bf = jnp.bfloat16
    h1 = jnp.maximum(
        jnp.dot(x.astype(bf), w1.astype(bf), preferred_element_type=jnp.float32) + b1, 0.0)
    h2 = jnp.maximum(
        jnp.dot(h1.astype(bf), w2.astype(bf), preferred_element_type=jnp.float32) + b2, 0.0)
    logits = jnp.dot(h2.astype(bf), w3.astype(bf),
                     preferred_element_type=jnp.float32) + b3
    return jax.nn.softmax(logits, axis=-1)


if __name__ == "__main__":
    key = jax.random.PRNGKey(0)
    k_x, k_p, k_big = jax.random.split(key, 3)

    batch, input_dim, output_dim = 8, 16, 8
    x = jax.random.normal(k_x, (batch, input_dim), dtype=jnp.float32)
    params = init_params(k_p, input_dim, output_dim)

    # Small-batch check (single grid step).
    out = jax.block_until_ready(ppo_policy_forward(x, params))
    ref = reference_forward(x, params)
    assert out.shape == (batch, output_dim)
    assert jnp.allclose(jnp.sum(out, axis=-1), 1.0, atol=1e-4)
    assert jnp.allclose(out, ref, atol=2e-2, rtol=2e-2)

    # Larger batch exercising batch tiling + padding (TB=256, 2 grid steps).
    xb = jax.random.normal(k_big, (300, input_dim), dtype=jnp.float32)
    out_big = jax.block_until_ready(ppo_policy_forward(xb, params))
    ref_big = reference_forward(xb, params)
    assert out_big.shape == (300, output_dim)
    assert jnp.allclose(jnp.sum(out_big, axis=-1), 1.0, atol=1e-4)
    assert jnp.allclose(out_big, ref_big, atol=2e-2, rtol=2e-2)

    print("KERNEL_OK")
</pallas_src>

<mosaic_0001>
module attributes {stable_mosaic.version = 11 : i64} {
  func.func @_mlp_policy_kernel(%arg0: i32, %arg1: memref<8x16xbf16, #tpu.memory_space<vmem>>, %arg2: memref<16x128xbf16, #tpu.memory_space<vmem>>, %arg3: memref<1x128xf32, #tpu.memory_space<vmem>>, %arg4: memref<128x128xbf16, #tpu.memory_space<vmem>>, %arg5: memref<1x128xf32, #tpu.memory_space<vmem>>, %arg6: memref<128x8xbf16, #tpu.memory_space<vmem>>, %arg7: memref<1x8xf32, #tpu.memory_space<vmem>>, %arg8: memref<8x8xf32, #tpu.memory_space<vmem>>) attributes {dimension_semantics = [#tpu.dimension_semantics<parallel>], iteration_bounds = array<i64: 1>, scalar_prefetch = 0 : i64, scratch_operands = 0 : i64, tpu.core_type = #tpu.core_type<tc>, window_params = [{transform_indices = @transform_0, window_bounds = array<i64: 8, 16>}, {pipeline_mode = #tpu.pipeline_mode<synchronous>, transform_indices = @transform_1, window_bounds = array<i64: 16, 128>}, {pipeline_mode = #tpu.pipeline_mode<synchronous>, transform_indices = @transform_2, window_bounds = array<i64: 1, 128>}, {pipeline_mode = #tpu.pipeline_mode<synchronous>, transform_indices = @transform_3, window_bounds = array<i64: 128, 128>}, {pipeline_mode = #tpu.pipeline_mode<synchronous>, transform_indices = @transform_4, window_bounds = array<i64: 1, 128>}, {pipeline_mode = #tpu.pipeline_mode<synchronous>, transform_indices = @transform_5, window_bounds = array<i64: 128, 8>}, {pipeline_mode = #tpu.pipeline_mode<synchronous>, transform_indices = @transform_6, window_bounds = array<i64: 1, 8>}, {transform_indices = @transform_7, window_bounds = array<i64: 8, 8>}]} {
    %c0 = arith.constant 0 : index
    %c0_0 = arith.constant 0 : index
    %0 = vector.load %arg1[%c0, %c0_0] : memref<8x16xbf16, #tpu.memory_space<vmem>>, vector<8x16xbf16>
    %c0_1 = arith.constant 0 : index
    %c0_2 = arith.constant 0 : index
    %1 = vector.load %arg2[%c0_1, %c0_2] : memref<16x128xbf16, #tpu.memory_space<vmem>>, vector<16x128xbf16>
    %cst = arith.constant dense<0.000000e+00> : vector<8x128xf32>
    %2 = tpu.matmul %0, %1, %cst {dimension_numbers = #tpu.dot_dimension_numbers<[1], [0], [0], [1], [0, 0, 1, 1], [], []>} : vector<8x16xbf16>, vector<16x128xbf16>, vector<8x128xf32> -> vector<8x128xf32>
    %c0_3 = arith.constant 0 : index
    %c0_4 = arith.constant 0 : index
    %3 = vector.load %arg3[%c0_3, %c0_4] : memref<1x128xf32, #tpu.memory_space<vmem>>, vector<1x128xf32>
    %4 = vector.broadcast %3 : vector<1x128xf32> to vector<8x128xf32>
    %5 = arith.addf %2, %4 : vector<8x128xf32>
    %cst_5 = arith.constant 0.000000e+00 : f32
    %6 = vector.broadcast %cst_5 : f32 to vector<8x128xf32>
    %7 = arith.maximumf %5, %6 : vector<8x128xf32>
    %8 = arith.truncf %7 : vector<8x128xf32> to vector<8x128xbf16>
    %c0_6 = arith.constant 0 : index
    %c0_7 = arith.constant 0 : index
    %9 = vector.load %arg4[%c0_6, %c0_7] : memref<128x128xbf16, #tpu.memory_space<vmem>>, vector<128x128xbf16>
    %cst_8 = arith.constant dense<0.000000e+00> : vector<8x128xf32>
    %10 = tpu.matmul %8, %9, %cst_8 {dimension_numbers = #tpu.dot_dimension_numbers<[1], [0], [0], [1], [0, 0, 1, 1], [], []>} : vector<8x128xbf16>, vector<128x128xbf16>, vector<8x128xf32> -> vector<8x128xf32>
    %c0_9 = arith.constant 0 : index
    %c0_10 = arith.constant 0 : index
    %11 = vector.load %arg5[%c0_9, %c0_10] : memref<1x128xf32, #tpu.memory_space<vmem>>, vector<1x128xf32>
    %12 = vector.broadcast %11 : vector<1x128xf32> to vector<8x128xf32>
    %13 = arith.addf %10, %12 : vector<8x128xf32>
    %cst_11 = arith.constant 0.000000e+00 : f32
    %14 = vector.broadcast %cst_11 : f32 to vector<8x128xf32>
    %15 = arith.maximumf %13, %14 : vector<8x128xf32>
    %16 = arith.truncf %15 : vector<8x128xf32> to vector<8x128xbf16>
    %c0_12 = arith.constant 0 : index
    %c0_13 = arith.constant 0 : index
    %17 = vector.load %arg6[%c0_12, %c0_13] : memref<128x8xbf16, #tpu.memory_space<vmem>>, vector<128x8xbf16>
    %cst_14 = arith.constant dense<0.000000e+00> : vector<8x8xf32>
    %18 = tpu.matmul %16, %17, %cst_14 {dimension_numbers = #tpu.dot_dimension_numbers<[1], [0], [0], [1], [0, 0, 1, 1], [], []>} : vector<8x128xbf16>, vector<128x8xbf16>, vector<8x8xf32> -> vector<8x8xf32>
    %c0_15 = arith.constant 0 : index
    %c0_16 = arith.constant 0 : index
    %19 = vector.load %arg7[%c0_15, %c0_16] : memref<1x8xf32, #tpu.memory_space<vmem>>, vector<1x8xf32>
    %20 = vector.broadcast %19 : vector<1x8xf32> to vector<8x8xf32>
    %21 = arith.addf %18, %20 : vector<8x8xf32>
    %cst_17 = arith.constant dense<0xFF800000> : vector<8xf32>
    %22 = vector.multi_reduction <maximumf>, %21, %cst_17 [1] : vector<8x8xf32> to vector<8xf32>
    %23 = vector.shape_cast %22 : vector<8xf32> to vector<8x1xf32>
    %24 = vector.broadcast %23 : vector<8x1xf32> to vector<8x8xf32>
    %25 = arith.subf %21, %24 : vector<8x8xf32>
    %26 = math.exp %25 : vector<8x8xf32>
    %cst_18 = arith.constant dense<0.000000e+00> : vector<8xf32>
    %27 = vector.multi_reduction <add>, %26, %cst_18 [1] : vector<8x8xf32> to vector<8xf32>
    %28 = vector.shape_cast %27 : vector<8xf32> to vector<8x1xf32>
    %29 = vector.broadcast %28 : vector<8x1xf32> to vector<8x8xf32>
    %30 = arith.divf %26, %29 : vector<8x8xf32>
    %c0_19 = arith.constant 0 : index
    %c0_20 = arith.constant 0 : index
    %31 = vector.load %arg8[%c0_19, %c0_20] : memref<8x8xf32, #tpu.memory_space<vmem>>, vector<8x8xf32>
    tpu.vector_store %arg8[%c0_19, %c0_20], %30 {strides = array<i32>} : memref<8x8xf32, #tpu.memory_space<vmem>>, vector<8x8xf32>,
    return
  }
  func.func @transform_0(%arg0: i32) -> (i32, i32) {
    %c0_i32 = arith.constant 0 : i32
    %c0_i32_0 = arith.constant 0 : i32
    return %arg0, %c0_i32 : i32, i32
  }
  func.func @transform_1(%arg0: i32) -> (i32, i32) {
    %c0_i32 = arith.constant 0 : i32
    %c0_i32_0 = arith.constant 0 : i32
    %c0_i32_1 = arith.constant 0 : i32
    return %c0_i32, %c0_i32_0 : i32, i32
  }
  func.func @transform_2(%arg0: i32) -> (i32, i32) {
    %c0_i32 = arith.constant 0 : i32
    %c0_i32_0 = arith.constant 0 : i32
    %c0_i32_1 = arith.constant 0 : i32
    return %c0_i32, %c0_i32_0 : i32, i32
  }
  func.func @transform_3(%arg0: i32) -> (i32, i32) {
    %c0_i32 = arith.constant 0 : i32
    %c0_i32_0 = arith.constant 0 : i32
    %c0_i32_1 = arith.constant 0 : i32
    return %c0_i32, %c0_i32_0 : i32, i32
  }
  func.func @transform_4(%arg0: i32) -> (i32, i32) {
    %c0_i32 = arith.constant 0 : i32
    %c0_i32_0 = arith.constant 0 : i32
    %c0_i32_1 = arith.constant 0 : i32
    return %c0_i32, %c0_i32_0 : i32, i32
  }
  func.func @transform_5(%arg0: i32) -> (i32, i32) {
    %c0_i32 = arith.constant 0 : i32
    %c0_i32_0 = arith.constant 0 : i32
    %c0_i32_1 = arith.constant 0 : i32
    return %c0_i32, %c0_i32_0 : i32, i32
  }
  func.func @transform_6(%arg0: i32) -> (i32, i32) {
    %c0_i32 = arith.constant 0 : i32
    %c0_i32_0 = arith.constant 0 : i32
    %c0_i32_1 = arith.constant 0 : i32
    return %c0_i32, %c0_i32_0 : i32, i32
  }
  func.func @transform_7(%arg0: i32) -> (i32, i32) {
    %c0_i32 = arith.constant 0 : i32
    %c0_i32_0 = arith.constant 0 : i32
    return %arg0, %c0_i32 : i32, i32
  }
}

</mosaic_0001>

<bundles_post_ra>
// kernel: tpu_custom_call.1
= control target key start
LH: loop header
LB: loop body
LE: loop exit
PB: predicated region body
PF: predicated region fallthrough
CT: control target
= control target key end

     0   :  { %v476_v1 = vmov 0.0   ;;  %vm477_vm0 = vmmov 0   ;;  %vm44_vm1 = vcmask 130048   ;;  %s617_s0 = inlined_call_operand.vmem [shape: bf16[8,16], index: 0, kind: input, shape index: {}]   ;;  %s618_s1 = inlined_call_operand.vmem [shape: bf16[16,128], index: 1, kind: input, shape index: {}]   ;;  %s619_s2 = inlined_call_operand.vmem [shape: f32[1,128], index: 2, kind: input, shape index: {}]   ;;  %s620_s3 = inlined_call_operand.vmem [shape: bf16[128,128], index: 3, kind: input, shape index: {}]   ;;  %s621_s4 = inlined_call_operand.vmem [shape: f32[1,128], index: 4, kind: input, shape index: {}]   ;;  %s622_s5 = inlined_call_operand.vmem [shape: bf16[128,8], index: 5, kind: input, shape index: {}]   ;;  %s623_s6 = inlined_call_operand.vmem [shape: f32[1,8], index: 6, kind: input, shape index: {}]   ;;  %s624_s7 = inlined_call_operand.hbm [shape: f32[8,8], index: 7, kind: output, shape index: {}]  }
   0x1   :  { %v431_v0 = vld [vmem:[%s618_s1] sm:$0xff]   ;;  %382 = vmatprep.subr.bf16.mxu0 %v476_v1  ;;  %388 = vmatprep.subr.bf16.mxu1 %v476_v1  ;;  %v433_v4 = vld [vmem:[%s620_s3 + $0x8] sm:$0xff]   ;;  %v434_v5 = vld [vmem:[%s620_s3 + $0x10] sm:$0xff]  }
   0x2   :  { %v28_v2 = vld [vmem:[%s617_s0] sm:$0xf]  ;;  %383 = vmatpush3.bf16.msra.mxu0 %v431_v0  ;;  %384 = vmatprep.mubr.msk.bf16.mxu0 %vm477_vm0, %v476_v1  ;;  %v435_v6 = vld [vmem:[%s620_s3 + $0x18] sm:$0xff]  }
   0x3   :  { %v432_v3 = vld [vmem:[%s620_s3] sm:$0xff]   ;;  %404 = vmatprep.mubr.msk.bf16.mxu1 %vm477_vm0, %v476_v1  ;;  %408 = vmatprep.subr.bf16.mxu0 %v476_v1 }
   0x4   :  { %389 = vmatpush3.bf16.msra.mxu1 %v432_v3 }
   0x5   :  { %385 = vmatmul.mubr.msk.bf16.vlgmr.msra.gmra.mrb[0].mxu0 %vm44_vm1, %v28_v2  ;;  %390 = vmatprep.subr.bf16.mxu1 %v476_v1 }
   0x6   :  { %424 = vmatprep.mubr.msk.bf16.mxu0 %vm477_vm0, %v476_v1 }
   0x8   :  { %391 = vmatpush3.bf16.msra.mxu1 %v433_v4 }
   0x9   :  { %392 = vmatprep.subr.bf16.mxu1 %v476_v1 }
   0xc   :  { %393 = vmatpush3.bf16.msra.mxu1 %v434_v5 }
   0xd   :  { %394 = vmatprep.subr.bf16.mxu1 %v476_v1 }
   0xe   :  { %12 = vsyncpa [#allocation3], 0  ;;  %v436_v7 = vld [vmem:[%s620_s3 + $0x20] sm:$0xff]   ;;  %v437_v8 = vld [vmem:[%s620_s3 + $0x28] sm:$0xff]   ;;  %vm314_vm2 = vcmask 64512  }
   0xf   :  { %v438_v9 = vld [vmem:[%s620_s3 + $0x30] sm:$0xff]   ;;  %v439_v10 = vld [vmem:[%s620_s3 + $0x38] sm:$0xff]   ;;  %v440_v11 = vld [vmem:[%s622_s5] sm:$0xff]  }
  0x10   :  { %395 = vmatpush3.bf16.msra.mxu1 %v435_v6  ;;  %409 = vmatpush3.bf16.msra.mxu0 %v440_v11  ;;  %v441_v12 = vld [vmem:[%s622_s5 + $0x8] sm:$0xff]   ;;  %v442_v13 = vld [vmem:[%s622_s5 + $0x10] sm:$0xff]   ;;  %v443_v14 = vld [vmem:[%s622_s5 + $0x18] sm:$0xff]  }
  0x11   :  { %396 = vmatprep.subr.bf16.mxu1 %v476_v1  ;;  %410 = vmatprep.subr.bf16.mxu0 %v476_v1  ;;  %v444_v15 = vld [vmem:[%s622_s5 + $0x20] sm:$0xff]   ;;  %v445_v16 = vld [vmem:[%s622_s5 + $0x28] sm:$0xff]   ;;  %v446_v25 = vld [vmem:[%s622_s5 + $0x30] sm:$0xff]  }
  0x12   :  { %v341_v17 = vld [vmem:[%s619_s2] ss:$0 sm:$0xff]  ;;  %v447_v26 = vld [vmem:[%s622_s5 + $0x38] sm:$0xff]  }
  0x13   :  { %v344_v27 = vld [vmem:[%s621_s4] ss:$0 sm:$0xff]  ;;  %s478_s4 = smov [#allocation2]  }
  0x14   :  { %397 = vmatpush3.bf16.msra.mxu1 %v436_v7  ;;  %411 = vmatpush3.bf16.msra.mxu0 %v441_v12  ;;  %v353_v35 = vld [vmem:[%s623_s6] ss:$0 sm:$0xff]  ;;  %s333_s5 = sshll.u32 %s478_s4, 4  ;;  %s334_s5 = int_to_ptr.vmem [resolvable:$true] %s333_s5 }
  0x15   :  { %398 = vmatprep.subr.bf16.mxu1 %v476_v1  ;;  %412 = vmatprep.subr.bf16.mxu0 %v476_v1  ;;  %s452_s6 = scalar_lea.vmem %s334_s5, 128  ;;  %p457_p1 = scmp.lt.s32.totalorder %s334_s5, %s334_s5 }
  0x16   :  { %p453_p0 = scmp.ne.s32.totalorder %s334_s5, %s452_s6  ;;  %p458_p2 = scmp.lt.s32.totalorder %s452_s6, %s452_s6 }
  0x18   :  { %399 = vmatpush3.bf16.msra.mxu1 %v437_v8  ;;  %413 = vmatpush3.bf16.msra.mxu0 %v442_v13  ;;  %p459_p3 = por %p458_p2, %p457_p1 }
  0x19   :  { %400 = vmatprep.subr.bf16.mxu1 %v476_v1  ;;  %414 = vmatprep.subr.bf16.mxu0 %v476_v1 }
  0x1a   :  { %p460_p4 = pnand %p459_p3, %p453_p0 }
  0x1c   :  { %401 = vmatpush3.bf16.msra.mxu1 %v438_v9  ;;  %415 = vmatpush3.bf16.msra.mxu0 %v443_v14 }
  0x1d   :  { %402 = vmatprep.subr.bf16.mxu1 %v476_v1  ;;  %416 = vmatprep.subr.bf16.mxu0 %v476_v1 }
  0x20   :  { %403 = vmatpush3.bf16.msra.mxu1 %v439_v10  ;;  %417 = vmatpush3.bf16.msra.mxu0 %v444_v15 }
  0x21   :  { %418 = vmatprep.subr.bf16.mxu0 %v476_v1 }
  0x24   :  { %419 = vmatpush3.bf16.msra.mxu0 %v445_v16 }
  0x25   :  { %420 = vmatprep.subr.bf16.mxu0 %v476_v1 }
  0x28   :  { %421 = vmatpush3.bf16.msra.mxu0 %v446_v25 }
  0x29   :  { %422 = vmatprep.subr.bf16.mxu0 %v476_v1 }
  0x2c   :  { %423 = vmatpush3.bf16.msra.mxu0 %v447_v26 }
  0xd8   :  { %v82_v18 = vpop.f32.mrb[0].mxu0 }
  0xd9   :  { %v83_v19 = vadd.f32 %v341_v17, %v82_v18  ;;  %v386_v20 = vpop.f32.mrb[1].mxu0 }
  0xda   :  { %v85_v21 = vpop.f32.mrb[2].mxu0 }
  0xdb   :  { %v88_v22 = vmax.f32 %v83_v19, 0.0  ;;  %v387_v23 = vpop.f32.mrb[3].mxu0 }
  0xdd   :  { %v89_v24 = vpack.c.bf16 %v88_v22, %v88_v22 }
  0xdf   :  { %405 = vmatmul.mubr.bf16.vlgmr.msra.gmra.mrb[0].mxu1 %v89_v24 }
 0x1b2   :  { %v195_v28 = vpop.f32.mrb[0].mxu1 }
 0x1b3   :  { %v196_v29 = vadd.f32 %v344_v27, %v195_v28  ;;  %v406_v30 = vpop.f32.mrb[1].mxu1 }
 0x1b4   :  { %v198_v31 = vpop.f32.mrb[2].mxu1 }
 0x1b5   :  { %v201_v32 = vmax.f32 %v196_v29, 0.0  ;;  %v407_v33 = vpop.f32.mrb[3].mxu1 }
 0x1b7   :  { %v202_v34 = vpack.c.bf16 %v201_v32, %v201_v32 }
 0x1b9   :  { %425 = vmatmul.mubr.bf16.vlgmr.msra.gmra.mrb[4].mxu0 %v202_v34 }
 0x28c   :  { %v308_v36 = vpop.f32.mrb[4].mxu0 }
 0x28d   :  { %v309_v37 = vadd.f32 %v353_v35, %v308_v36  ;;  %v426_v38 = vpop.f32.mrb[5].mxu0 }
 0x28e   :  { %v311_v39 = vpop.f32.mrb[6].mxu0 }
 0x28f   :  { %v427_v40 = vpop.f32.mrb[7].mxu0  ;;  %v315_v41 = vsel %vm314_vm2, %v309_v37, -inf }
 0x290   :  { %316 = vmax.xlane.f32.xlu0 %v315_v41 }
 0x31d   :  { %v317_v42 = vpop.xlane.xlu0 %316 }
 0x31e   :  { %v318_v43 = vsub.f32 %v309_v37, %v317_v42 }
 0x320   :  { %v319_v44 = vmul.f32 1.442695, %v318_v43 }
 0x322   :  { %448 = vpow2.f32 %v319_v44 }
 0x32c   :  { %v449_v45 = vpop.eup %448 }
 0x32d   :  { %v321_v46 = vsel %vm314_vm2, %v449_v45, 0.0 }
 0x32e   :  { %322 = vadd.xlane.f32.xlu0 %v321_v46 }
 0x3bb   :  { %v323_v47 = vpop.xlane.xlu0 %322 }
 0x3bc   :  { %450 = vrcp.f32 %v323_v47 }
 0x3c6   :  { %v451_v48 = vpop.eup %450 }
 0x3c7   :  { %v325_v49 = vmul.f32 %v451_v48, %v449_v45 }
 0x3c9   :  { %326 = vst.msk [vmem:[#allocation2] sm:$0xff] %vm314_vm2, %v325_v49 }
 0x3ca   :  { %463 = shalt.err (!%p460_p4)
}
 0x3cb   :  { %s464_s16 = scalar_lea.hbm %s624_s7, 128 }
 0x3cc   :  { %p465_p5 = scmp.ne.s32.totalorder %s624_s7, %s464_s16  ;;  %p468_p6 = scmp.lt.u32.totalorder %s464_s16, %s624_s7 }
 0x3ce   :  { %p470_p7 = pnand %p468_p6, %p465_p5 }
 0x3d0   :  { %473 = shalt.err (!%p470_p7)
}
 0x3d1   :  { %336 = dma.vmem_to_hbm [thread:$0]  %s334_s5, 128, %s624_s7, [#allocation3]  }
 0x3d2   :  { %474 = dma.done.wait [#allocation3], 128  }
 0x3d3   :  { %475 = vsyncadd [#allocation3], 4294967168 }
 0x3d4   :  { %340 = vsyncpa [#allocation3], 1 }

</bundles_post_ra>
